<compile_context>
chip_gen: v5e
topology: v5e:2x2
jax: 0.10.0
libtpu: 0.0.40
codegen_flags: <defaults>
</compile_context>

<pallas_src>
import functools

import jax
import jax.numpy as jnp
from jax.experimental import pallas as pl
from jax.experimental.pallas import tpu as pltpu

_MiB = 1024 * 1024
_PIPELINE_VMEM_BUDGET = 24 * _MiB  # double-buffered slab budget (fits v7x 64 MiB/TC)


def _round_up(x: int, m: int) -> int:
    return (x + m - 1) // m * m


def _sublane(dtype) -> int:
    return {4: 8, 2: 16, 1: 32}.get(jnp.dtype(dtype).itemsize, 8)


def _pick_tile_n(n_rows, block_width, itemsize, n_streams, sublane, requested):
    """Largest row tile whose pipelined slabs fit the VMEM budget."""
    bytes_per_row = max(1, n_streams * 2 * block_width * itemsize)  # x2: double buffer
    vmem_cap = max(sublane, (_PIPELINE_VMEM_BUDGET // bytes_per_row) // sublane * sublane)
    if n_rows <= sublane:
        return n_rows  # single full-extent row block (allowed even if not 8-aligned)
    row_cap = (n_rows // sublane) * sublane  # keep any ragged tail as a partial *last* block
    return max(sublane, min(_round_up(requested, sublane), vmem_cap, row_cap))


def _vmem_limit(footprint_bytes: int) -> int:
    # Explicit scoped-VMEM limit: footprint + margin, >= 32 MiB (covers v5e's
    # 16 MiB default), capped at 48 MiB to leave headroom on v7x (64 MiB/TC).
    return int(min(max(footprint_bytes + 8 * _MiB, 32 * _MiB), 48 * _MiB))


def _compiler_params(footprint_bytes):
    return pltpu.CompilerParams(
        dimension_semantics=("parallel",),
        vmem_limit_bytes=_vmem_limit(footprint_bytes),
    )


# ---------------------------------------------------------------------------
# Kernels
# ---------------------------------------------------------------------------
def _copy_kernel(src_ref, out_ref):
    out_ref[...] = src_ref[...]


def _copy_cols_kernel(base_hbm_ref, src_ref, out_ref):
    # `base` is aliased to the output buffer and never DMA'd; only the first
    # `d` columns of the output are overwritten with source.
    del base_hbm_ref
    out_ref[...] = src_ref[...]


def _masked_swap_kernel(base_ref, src_ref, out_ref, *, d, feat):
    lane = jax.lax.broadcasted_iota(jnp.int32, out_ref.shape, dimension=1)
    if feat == out_ref.shape[-1]:
        mask = lane < d
    else:  # lane-folded layout: each row packs (W // feat) logical rows
        mask = (lane % feat) < d
    out_ref[...] = jnp.where(mask, src_ref[...], base_ref[...])


# ---------------------------------------------------------------------------
# Dispatch helpers
# ---------------------------------------------------------------------------
def _maybe_fold_lanes(n_rows, feat):
    """Fold (N, H) -> (N/k, k*H) when H < 128 so stores are lane-dense."""
    if feat < 128 and 128 % feat == 0:
        k = 128 // feat
        if n_rows % k == 0:
            return n_rows // k, k * feat
    return n_rows, feat


def _pallas_copy(x2d, *, tile_n_req):
    """Streaming copy (used for the full-swap / d<=0 paths): 2 HBM streams."""
    n, feat = x2d.shape
    dtype = x2d.dtype
    itemsize = jnp.dtype(dtype).itemsize
    sub = _sublane(dtype)

    nf, w = _maybe_fold_lanes(n, feat)
    xf = x2d.reshape(nf, w)

    tile_n = _pick_tile_n(nf, w, itemsize, 2, sub, tile_n_req)
    footprint = 2 * 2 * tile_n * w * itemsize
    out = pl.pallas_call(
        _copy_kernel,
        out_shape=jax.ShapeDtypeStruct((nf, w), dtype),
        grid=(pl.cdiv(nf, tile_n),),
        in_specs=[pl.BlockSpec((tile_n, w), lambda i: (i, 0))],
        out_specs=pl.BlockSpec((tile_n, w), lambda i: (i, 0)),
        compiler_params=_compiler_params(footprint),
        cost_estimate=pl.CostEstimate(
            flops=0, transcendentals=0, bytes_accessed=2 * nf * w * itemsize
        ),
    )(xf)
    return out.reshape(n, feat)


def _swap_cols_aliased(base2d, src2d, d, *, tile_n_req):
    """Aligned partial swap: alias base to the output, write only cols [0, d)."""
    n, feat = base2d.shape
    dtype = base2d.dtype
    itemsize = jnp.dtype(dtype).itemsize
    sub = _sublane(dtype)

    tile_n = _pick_tile_n(n, d, itemsize, 2, sub, tile_n_req)
    footprint = 2 * 2 * tile_n * d * itemsize
    return pl.pallas_call(
        _copy_cols_kernel,
        out_shape=jax.ShapeDtypeStruct((n, feat), dtype),
        grid=(pl.cdiv(n, tile_n),),
        in_specs=[
            pl.BlockSpec(memory_space=pl.ANY),            # base: aliased, never DMA'd
            pl.BlockSpec((tile_n, d), lambda i: (i, 0)),  # source cols [0, d)
        ],
        out_specs=pl.BlockSpec((tile_n, d), lambda i: (i, 0)),
        input_output_aliases={0: 0},                      # output buffer == base buffer
        compiler_params=_compiler_params(footprint),
        cost_estimate=pl.CostEstimate(
            flops=0, transcendentals=0, bytes_accessed=2 * n * d * itemsize
        ),
    )(base2d, src2d)


def _swap_masked(base2d, src2d, d, *, tile_n_req):
    """General partial swap: lane-masked select over full-width tiles."""
    n, feat = base2d.shape
    dtype = base2d.dtype
    itemsize = jnp.dtype(dtype).itemsize
    sub = _sublane(dtype)

    nf, w = _maybe_fold_lanes(n, feat)
    bf = base2d.reshape(nf, w)
    sf = src2d.reshape(nf, w)

    tile_n = _pick_tile_n(nf, w, itemsize, 3, sub, tile_n_req)
    footprint = 3 * 2 * tile_n * w * itemsize
    kernel = functools.partial(_masked_swap_kernel, d=d, feat=feat)
    out = pl.pallas_call(
        kernel,
        out_shape=jax.ShapeDtypeStruct((nf, w), dtype),
        grid=(pl.cdiv(nf, tile_n),),
        in_specs=[
            pl.BlockSpec((tile_n, w), lambda i: (i, 0)),
            pl.BlockSpec((tile_n, w), lambda i: (i, 0)),
        ],
        out_specs=pl.BlockSpec((tile_n, w), lambda i: (i, 0)),
        compiler_params=_compiler_params(footprint),
        cost_estimate=pl.CostEstimate(
            flops=0, transcendentals=0, bytes_accessed=3 * nf * w * itemsize
        ),
    )(bf, sf)
    return out.reshape(n, feat)


# ---------------------------------------------------------------------------
# Public wrapper == VanillaIntervention.forward (subspaces=None)
# ---------------------------------------------------------------------------
def vanilla_intervention(base, source, interchange_dim=None, *, tile_n=1024):
    """output = concat(source[..., :d], base[..., d:]) with d = interchange_dim."""
    assert base.shape == source.shape, "source auto-broadcast not implemented"
    assert base.dtype == source.dtype
    orig_shape = base.shape
    H = orig_shape[-1]
    d = H if interchange_dim is None else int(interchange_dim)

    base2d = base.reshape(-1, H)
    src2d = source.reshape(-1, H)
    N = base2d.shape[0]
    if N == 0 or H == 0:
        return base

    if d <= 0:
        out2d = _pallas_copy(base2d, tile_n_req=tile_n)          # no features swapped
    elif d >= H:
        out2d = _pallas_copy(src2d, tile_n_req=tile_n)           # full swap: drop base stream
    elif d % 128 == 0:
        out2d = _swap_cols_aliased(base2d, src2d, d, tile_n_req=tile_n)
    else:
        out2d = _swap_masked(base2d, src2d, d, tile_n_req=tile_n)
    return out2d.reshape(orig_shape)


if __name__ == "__main__":
    key = jax.random.PRNGKey(0)
    k_base, k_src, k_base2, k_src2 = jax.random.split(key, 4)

    batch, seq, hidden = 2, 8, 32
    base = jax.random.normal(k_base, (batch, seq, hidden), dtype=jnp.float32)
    source = jax.random.normal(k_src, (batch, seq, hidden), dtype=jnp.float32)

    # 1) Default VanillaIntervention: interchange_dim == embed_dim (full swap).
    ref_full = source
    out_full = jax.block_until_ready(vanilla_intervention(base, source))
    assert out_full.shape == base.shape and out_full.dtype == base.dtype
    assert jnp.array_equal(out_full, ref_full)

    # 2) set_interchange_dim(hidden // 2): partial swap (masked path, lane-folded).
    d = hidden // 2
    ref_part = jnp.concatenate([source[..., :d], base[..., d:]], axis=-1)
    out_part = jax.block_until_ready(
        vanilla_intervention(base, source, interchange_dim=d)
    )
    assert jnp.array_equal(out_part, ref_part)

    # 3) Row count not a multiple of the tile: exercises the ragged-grid path.
    base_odd = base.reshape(-1, hidden)[:15]
    src_odd = source.reshape(-1, hidden)[:15]
    ref_odd = jnp.concatenate([src_odd[..., :d], base_odd[..., d:]], axis=-1)
    out_odd = jax.block_until_ready(
        vanilla_intervention(base_odd, src_odd, interchange_dim=d)
    )
    assert jnp.array_equal(out_odd, ref_odd)

    # 4) 128-aligned partial swap: exercises the aliased column-window path.
    hidden2, d2 = 256, 128
    base2 = jax.random.normal(k_base2, (batch, seq, hidden2), dtype=jnp.float32)
    source2 = jax.random.normal(k_src2, (batch, seq, hidden2), dtype=jnp.float32)
    ref_aligned = jnp.concatenate([source2[..., :d2], base2[..., d2:]], axis=-1)
    out_aligned = jax.block_until_ready(
        vanilla_intervention(base2, source2, interchange_dim=d2)
    )
    assert jnp.array_equal(out_aligned, ref_aligned)

    print("KERNEL_OK")
</pallas_src>

<mosaic_0001>
module attributes {stable_mosaic.version = 11 : i64} {
  func.func @_copy_kernel(%arg0: i32, %arg1: memref<4x128xf32, #tpu.memory_space<vmem>>, %arg2: memref<4x128xf32, #tpu.memory_space<vmem>>) attributes {dimension_semantics = [#tpu.dimension_semantics<parallel>], iteration_bounds = array<i64: 1>, scalar_prefetch = 0 : i64, scratch_operands = 0 : i64, tpu.core_type = #tpu.core_type<tc>, window_params = [{transform_indices = @transform_0, window_bounds = array<i64: 4, 128>}, {transform_indices = @transform_1, window_bounds = array<i64: 4, 128>}]} {
    %c0 = arith.constant 0 : index
    %c0_0 = arith.constant 0 : index
    %0 = vector.load %arg1[%c0, %c0_0] : memref<4x128xf32, #tpu.memory_space<vmem>>, vector<4x128xf32>
    %c0_1 = arith.constant 0 : index
    %c0_2 = arith.constant 0 : index
    %1 = vector.load %arg2[%c0_1, %c0_2] : memref<4x128xf32, #tpu.memory_space<vmem>>, vector<4x128xf32>
    tpu.vector_store %arg2[%c0_1, %c0_2], %0 {strides = array<i32>} : memref<4x128xf32, #tpu.memory_space<vmem>>, vector<4x128xf32>,
    return
  }
  func.func @transform_0(%arg0: i32) -> (i32, i32) {
    %c0_i32 = arith.constant 0 : i32
    %c0_i32_0 = arith.constant 0 : i32
    return %arg0, %c0_i32 : i32, i32
  }
  func.func @transform_1(%arg0: i32) -> (i32, i32) {
    %c0_i32 = arith.constant 0 : i32
    %c0_i32_0 = arith.constant 0 : i32
    return %arg0, %c0_i32 : i32, i32
  }
}

</mosaic_0001>

<bundles_post_ra>
// kernel: tpu_custom_call.1
= control target key start
LH: loop header
LB: loop body
LE: loop exit
PB: predicated region body
PF: predicated region fallthrough
CT: control target
= control target key end

     0   :  { %6 = vsyncpa [#allocation3], 0  ;;  %s114_s0 = inlined_call_operand.hbm [shape: f32[4,128], index: 0, kind: input, shape index: {}]   ;;  %s115_s1 = inlined_call_operand.hbm [shape: f32[4,128], index: 1, kind: output, shape index: {}]  }
   0x1   :  { %7 = vsyncpa [#allocation4], 0  ;;  %s13_s8 = sshll.u32 %s114_s0, 4  ;;  %s96_s9 = smov [#allocation2]   ;;  %s14_s8 = int_to_ptr.hbm [resolvable:$true] %s13_s8 }
   0x2   :  { %s15_s10 = sshll.u32 %s96_s9, 4  ;;  %s16_s10 = int_to_ptr.vmem [resolvable:$true] %s15_s10 }
   0x3   :  { %18 = dma.hbm_to_vmem [thread:$0]  %s14_s8, 64, %s16_s10, [#allocation3]  }
   0x4   :  { %92 = dma.done.wait [#allocation3], 64  }
   0x5   :  { %93 = vsyncadd [#allocation3], 4294967232  ;;  %s97_s11 = smov [#allocation5]   ;;  %s32_s15 = sshll.u32 %s115_s1, 4  ;;  %v23_v0 = vld [vmem:[#allocation2] sm:$0xf]  ;;  %s33_s15 = int_to_ptr.hbm [resolvable:$true] %s32_s15 }
   0x6   :  { %s30_s12 = sshll.u32 %s97_s11, 4  ;;  %24 = vst [vmem:[#allocation5] sm:$0xf] %v23_v0  ;;  %s31_s12 = int_to_ptr.vmem [resolvable:$true] %s30_s12 }
   0x7   :  { %35 = dma.vmem_to_hbm [thread:$0]  %s31_s12, 64, %s33_s15, [#allocation4]  }
   0x8   :  { %94 = dma.done.wait [#allocation4], 64  }
   0x9   :  { %95 = vsyncadd [#allocation4], 4294967232 }
   0xa   :  { %40 = vsyncpa [#allocation3], 1 }
   0xb   :  { %41 = vsyncpa [#allocation4], 1 }

</bundles_post_ra>
